<compile_context>
chip_gen: v7x
topology: tpu7x:2x2x1
jax: 0.10.0
libtpu: 0.0.40
codegen_flags: <defaults>
</compile_context>

<pallas_src>
import functools

import jax
import jax.numpy as jnp
from jax.experimental import pallas as pl
from jax.experimental.pallas import tpu as pltpu


# ---------------------------------------------------------------------------
# Fused kernel.  One grid step s:
#   if s < T : spatial conv of input frame s (in-kernel im2col via lane-offset
#              slices, KH*KW bf16 tap matmuls, f32 accumulate) -> ring[s % KT]
#   if s >= pt: temporal conv output frame t = s - pt from the ring
#              (KT bf16 matmuls with edge taps masked on the tiny weight)
# ---------------------------------------------------------------------------
def fused_kernel(x_ref, w2_ref, b_ref, wt_ref, o_ref, ring_ref, *,
                 T, KT, KH, KW, Wp, L_out):
    s = pl.program_id(0)          # pipeline step
    pt = KT // 2

    # Zero the ring once so leading-edge taps never touch uninitialized VMEM
    # (0-weight * NaN hazard).
    @pl.when(s == 0)
    def _init():
        ring_ref[...] = jnp.zeros_like(ring_ref)

    # ---- spatial conv of input frame s -> ring slot s % KT -----------------
    @pl.when(s < T)
    def _spatial():
        # Raw zero-padded frame, flattened row-major over (Hp, Wp): (C_in, L_in).
        # Upcast once to f32 so the unaligned lane-offset tap slices lower on
        # the rock-solid 32-bit relayout path; taps go back to bf16 for the MXU.
        xf = x_ref[0].astype(jnp.float32)
        acc = None
        for kh in range(KH):
            for kw in range(KW):
                off = kh * Wp + kw                         # static lane offset
                tap = xf[:, off:off + L_out].astype(jnp.bfloat16)  # (C_in, L_out)
                d = jnp.dot(w2_ref[kh * KW + kw], tap,
                            preferred_element_type=jnp.float32)
                acc = d if acc is None else acc + d
        y = acc + b_ref[...]                               # (C_out, L_out) f32
        ring_ref[s % KT] = y.astype(ring_ref.dtype)

    # ---- temporal conv: output frame t = s - pt (lane-dense (C_out, L_out)) -
    @pl.when(s >= pt)
    def _temporal():
        wts = wt_ref[...]                                  # (KT, C_out, C_out) bf16
        acc = None
        for dt in range(KT):                               # static, unrolled
            f = s + dt - (KT - 1)                          # conv2d frame for this tap
            valid = jnp.logical_and(f >= 0, f <= T - 1)
            # Mask the tiny (C_out, C_out) weight, not the big result.
            w_dt = wts[dt] * valid.astype(wts.dtype)
            slot = (s + dt + 1) % KT                       # == f % KT, always >= 0
            d = jnp.dot(w_dt, ring_ref[slot],
                        preferred_element_type=jnp.float32)
            acc = d if acc is None else acc + d
        o_ref[0] = acc.astype(o_ref.dtype)


# ---------------------------------------------------------------------------
# Wrapper.  Weight layouts mirror PyTorch:
#   w2d[co, ci, kh, kw]  == conv.weight          (C_out, C_in, KH, KW)
#   b2d[co]              == conv.bias            (C_out,)
#   wt[co, ci, dt]       == temp_conv.weight[..., 0, 0]   (C_out, C_out, KT)
# ---------------------------------------------------------------------------
def convnext_conv2p1d(x, w2d, b2d, wt):
    T, C_in, H, W = x.shape
    C_out, _, KH, KW = w2d.shape
    KT = wt.shape[-1]
    ph, pw, pt = KH // 2, KW // 2, KT // 2
    Hp, Wp = H + 2 * ph, W + 2 * pw

    def rup(n, m):
        return -(-n // m) * m

    L_out = rup(H * Wp, 128)                     # lane-dense output width
    max_off = (KH - 1) * Wp + (KW - 1)           # largest in-kernel tap offset
    L_in = rup(L_out + max_off, 128)             # streamed (padded) frame width

    # Raw input: pad spatially, flatten row-major, pad lanes, cast to bf16.
    # This is the ONLY per-frame HBM input stream (~1x raw size, not 9x im2col).
    x_pad = jnp.pad(x, ((0, 0), (0, 0), (ph, ph), (pw, pw)))
    x_flat = x_pad.reshape(T, C_in, Hp * Wp)
    x_flat = jnp.pad(x_flat, ((0, 0), (0, 0), (0, L_in - Hp * Wp)))
    x_flat = x_flat.astype(jnp.bfloat16)

    # Per-tap spatial weights: (KH*KW, C_out, C_in), tap index = kh*KW + kw.
    w_taps = jnp.transpose(w2d, (2, 3, 0, 1)).reshape(KH * KW, C_out, C_in)
    w_taps = w_taps.astype(jnp.bfloat16)
    b_col = b2d.reshape(C_out, 1).astype(jnp.float32)
    # Temporal weights: (KT, C_out, C_out) with wt_k[dt, co, ci] = wt[co, ci, dt].
    wt_k = jnp.transpose(wt, (2, 0, 1)).astype(jnp.bfloat16)

    kernel = functools.partial(fused_kernel, T=T, KT=KT, KH=KH, KW=KW,
                               Wp=Wp, L_out=L_out)

    z_flat = pl.pallas_call(
        kernel,
        out_shape=jax.ShapeDtypeStruct((T, C_out, L_out), jnp.bfloat16),
        grid=(T + pt,),
        in_specs=[
            # one raw padded frame per step (clamped during the pipeline tail)
            pl.BlockSpec((1, C_in, L_in), lambda s: (jnp.minimum(s, T - 1), 0, 0)),
            pl.BlockSpec((KH * KW, C_out, C_in), lambda s: (0, 0, 0)),
            pl.BlockSpec((C_out, 1), lambda s: (0, 0)),
            pl.BlockSpec((KT, C_out, C_out), lambda s: (0, 0, 0)),
        ],
        # output frame s - pt; block 0 stays resident during pipeline fill and
        # is first written at s == pt (before its block index changes).
        out_specs=pl.BlockSpec((1, C_out, L_out),
                               lambda s: (jnp.maximum(s - pt, 0), 0, 0)),
        scratch_shapes=[pltpu.VMEM((KT, C_out, L_out), jnp.bfloat16)],
        compiler_params=pltpu.CompilerParams(
            dimension_semantics=("arbitrary",),   # ring carries state across steps
            vmem_limit_bytes=32 * 1024 * 1024),
    )(x_flat, w_taps, b_col, wt_k)

    # Crop the lane padding back to (H, W); cast back to the caller's dtype.
    z = z_flat[:, :, :H * Wp].reshape(T, C_out, H, Wp)[:, :, :, :W]
    return z.astype(x.dtype)


# ---------------------------------------------------------------------------
# Pure-JAX reference (lax.conv, f32 HIGHEST) for correctness check.
# ---------------------------------------------------------------------------
def reference(x, w2d, b2d, wt):
    T, C_in, H, W = x.shape
    C_out, _, KH, KW = w2d.shape
    KT = wt.shape[-1]
    ph, pw, pt = KH // 2, KW // 2, KT // 2
    y = jax.lax.conv_general_dilated(
        x, w2d, window_strides=(1, 1),
        padding=((ph, ph), (pw, pw)),
        dimension_numbers=("NCHW", "OIHW", "NCHW"),
        precision=jax.lax.Precision.HIGHEST) + b2d[None, :, None, None]
    y2 = jnp.transpose(y, (1, 0, 2, 3)).reshape(1, C_out, T, H * W)
    wt4 = wt.reshape(C_out, C_out, KT, 1)
    z2 = jax.lax.conv_general_dilated(
        y2, wt4, window_strides=(1, 1),
        padding=((pt, pt), (0, 0)),
        dimension_numbers=("NCHW", "OIHW", "NCHW"),
        precision=jax.lax.Precision.HIGHEST)
    return jnp.transpose(z2.reshape(C_out, T, H, W), (1, 0, 2, 3))


if __name__ == "__main__":
    # Conv2d(4, 8, kernel_size=3, padding=1, bias=True), temporal_kernel_size=3.
    T, C_in, C_out, H, W = 4, 4, 8, 16, 16
    KH = KW = 3
    KT = 3

    key = jax.random.PRNGKey(0)
    kx, kw2, kb, kwt = jax.random.split(key, 4)

    x = jax.random.normal(kx, (T, C_in, H, W), jnp.float32)
    w2d = jax.random.normal(kw2, (C_out, C_in, KH, KW), jnp.float32) * 0.1
    b2d = jax.random.normal(kb, (C_out,), jnp.float32) * 0.1
    wt = jax.random.normal(kwt, (C_out, C_out, KT), jnp.float32) * 0.1

    out = jax.block_until_ready(jax.jit(convnext_conv2p1d)(x, w2d, b2d, wt))
    ref = jax.block_until_ready(reference(x, w2d, b2d, wt))

    assert out.shape == (T, C_out, H, W), out.shape
    # bf16 data path vs f32 HIGHEST reference -> loosened tolerance.
    err = float(jnp.max(jnp.abs(out - ref)))
    assert err < 5e-2, f"max abs err {err}"

    print("KERNEL_OK")
</pallas_src>

<mosaic_0001>
module attributes {stable_mosaic.version = 11 : i64} {
  func.func @fused_kernel(%arg0: i32, %arg1: memref<1x4x512xbf16, #tpu.memory_space<vmem>>, %arg2: memref<9x8x4xbf16, #tpu.memory_space<vmem>>, %arg3: memref<8x1xf32, #tpu.memory_space<vmem>>, %arg4: memref<3x8x8xbf16, #tpu.memory_space<vmem>>, %arg5: memref<1x8x384xbf16, #tpu.memory_space<vmem>>, %arg6: memref<3x8x384xbf16, #tpu.memory_space<vmem>>) attributes {dimension_semantics = [#tpu.dimension_semantics<arbitrary>], iteration_bounds = array<i64: 5>, scalar_prefetch = 0 : i64, scratch_operands = 1 : i64, tpu.core_type = #tpu.core_type<tc>, window_params = [{transform_indices = @transform_0, window_bounds = array<i64: 1, 4, 512>}, {pipeline_mode = #tpu.pipeline_mode<synchronous>, transform_indices = @transform_1, window_bounds = array<i64: 9, 8, 4>}, {pipeline_mode = #tpu.pipeline_mode<synchronous>, transform_indices = @transform_2, window_bounds = array<i64: 8, 1>}, {pipeline_mode = #tpu.pipeline_mode<synchronous>, transform_indices = @transform_3, window_bounds = array<i64: 3, 8, 8>}, {transform_indices = @transform_4, window_bounds = array<i64: 1, 8, 384>}]} {
    %c0_i32 = arith.constant 0 : i32
    %0 = arith.cmpi eq, %arg0, %c0_i32 : i32
    %1 = arith.extui %0 : i1 to i32
    %c0_i32_0 = arith.constant 0 : i32
    %2 = arith.cmpi ne, %1, %c0_i32_0 : i32
    scf.if %2 {
      %cst = arith.constant 0.000000e+00 : bf16
      %9 = vector.broadcast %cst : bf16 to vector<3x8x384xbf16>
      %c0 = arith.constant 0 : index
      %c0_3 = arith.constant 0 : index
      %c0_4 = arith.constant 0 : index
      %10 = vector.load %arg6[%c0, %c0_3, %c0_4] : memref<3x8x384xbf16, #tpu.memory_space<vmem>>, vector<3x8x384xbf16>
      tpu.vector_store %arg6[%c0, %c0_3, %c0_4], %9 {strides = array<i32>} : memref<3x8x384xbf16, #tpu.memory_space<vmem>>, vector<3x8x384xbf16>,
    } else {
    }
    %c4_i32 = arith.constant 4 : i32
    %3 = arith.cmpi slt, %arg0, %c4_i32 : i32
    %4 = arith.extui %3 : i1 to i32
    %c0_i32_1 = arith.constant 0 : i32
    %5 = arith.cmpi ne, %4, %c0_i32_1 : i32
    scf.if %5 {
      %c0 = arith.constant 0 : index
      %c0_3 = arith.constant 0 : index
      %c0_4 = arith.constant 0 : index
      %9 = vector.load %arg1[%c0, %c0_3, %c0_4] : memref<1x4x512xbf16, #tpu.memory_space<vmem>>, vector<1x4x512xbf16>
      %10 = vector.shape_cast %9 : vector<1x4x512xbf16> to vector<4x512xbf16>
      %11 = arith.extf %10 : vector<4x512xbf16> to vector<4x512xf32>
      %12 = vector.extract_strided_slice %11 {offsets = [0, 0], sizes = [4, 384], strides = [1, 1]} : vector<4x512xf32> to vector<4x384xf32>
      %13 = arith.truncf %12 : vector<4x384xf32> to vector<4x384xbf16>
      %c0_5 = arith.constant 0 : index
      %c0_6 = arith.constant 0 : index
      %c0_7 = arith.constant 0 : index
      %14 = vector.load %arg2[%c0_5, %c0_6, %c0_7] : memref<9x8x4xbf16, #tpu.memory_space<vmem>>, vector<1x8x4xbf16>
      %15 = vector.shape_cast %14 : vector<1x8x4xbf16> to vector<8x4xbf16>
      %cst = arith.constant dense<0.000000e+00> : vector<8x384xf32>
      %16 = tpu.matmul %15, %13, %cst {dimension_numbers = #tpu.dot_dimension_numbers<[1], [0], [0], [1], [0, 0, 1, 1], [], []>} : vector<8x4xbf16>, vector<4x384xbf16>, vector<8x384xf32> -> vector<8x384xf32>
      %17 = vector.extract_strided_slice %11 {offsets = [0, 1], sizes = [4, 384], strides = [1, 1]} : vector<4x512xf32> to vector<4x384xf32>
      %18 = arith.truncf %17 : vector<4x384xf32> to vector<4x384xbf16>
      %c1 = arith.constant 1 : index
      %c0_8 = arith.constant 0 : index
      %c0_9 = arith.constant 0 : index
      %19 = vector.load %arg2[%c1, %c0_8, %c0_9] : memref<9x8x4xbf16, #tpu.memory_space<vmem>>, vector<1x8x4xbf16>
      %20 = vector.shape_cast %19 : vector<1x8x4xbf16> to vector<8x4xbf16>
      %cst_10 = arith.constant dense<0.000000e+00> : vector<8x384xf32>
      %21 = tpu.matmul %20, %18, %cst_10 {dimension_numbers = #tpu.dot_dimension_numbers<[1], [0], [0], [1], [0, 0, 1, 1], [], []>} : vector<8x4xbf16>, vector<4x384xbf16>, vector<8x384xf32> -> vector<8x384xf32>
      %22 = arith.addf %16, %21 : vector<8x384xf32>
      %23 = vector.extract_strided_slice %11 {offsets = [0, 2], sizes = [4, 384], strides = [1, 1]} : vector<4x512xf32> to vector<4x384xf32>
      %24 = arith.truncf %23 : vector<4x384xf32> to vector<4x384xbf16>
      %c2 = arith.constant 2 : index
      %c0_11 = arith.constant 0 : index
      %c0_12 = arith.constant 0 : index
      %25 = vector.load %arg2[%c2, %c0_11, %c0_12] : memref<9x8x4xbf16, #tpu.memory_space<vmem>>, vector<1x8x4xbf16>
      %26 = vector.shape_cast %25 : vector<1x8x4xbf16> to vector<8x4xbf16>
      %cst_13 = arith.constant dense<0.000000e+00> : vector<8x384xf32>
      %27 = tpu.matmul %26, %24, %cst_13 {dimension_numbers = #tpu.dot_dimension_numbers<[1], [0], [0], [1], [0, 0, 1, 1], [], []>} : vector<8x4xbf16>, vector<4x384xbf16>, vector<8x384xf32> -> vector<8x384xf32>
      %28 = arith.addf %22, %27 : vector<8x384xf32>
      %29 = vector.extract_strided_slice %11 {offsets = [0, 18], sizes = [4, 384], strides = [1, 1]} : vector<4x512xf32> to vector<4x384xf32>
      %30 = arith.truncf %29 : vector<4x384xf32> to vector<4x384xbf16>
      %c3 = arith.constant 3 : index
      %c0_14 = arith.constant 0 : index
      %c0_15 = arith.constant 0 : index
      %31 = vector.load %arg2[%c3, %c0_14, %c0_15] : memref<9x8x4xbf16, #tpu.memory_space<vmem>>, vector<1x8x4xbf16>
      %32 = vector.shape_cast %31 : vector<1x8x4xbf16> to vector<8x4xbf16>
      %cst_16 = arith.constant dense<0.000000e+00> : vector<8x384xf32>
      %33 = tpu.matmul %32, %30, %cst_16 {dimension_numbers = #tpu.dot_dimension_numbers<[1], [0], [0], [1], [0, 0, 1, 1], [], []>} : vector<8x4xbf16>, vector<4x384xbf16>, vector<8x384xf32> -> vector<8x384xf32>
      %34 = arith.addf %28, %33 : vector<8x384xf32>
      %35 = vector.extract_strided_slice %11 {offsets = [0, 19], sizes = [4, 384], strides = [1, 1]} : vector<4x512xf32> to vector<4x384xf32>
      %36 = arith.truncf %35 : vector<4x384xf32> to vector<4x384xbf16>
      %c4 = arith.constant 4 : index
      %c0_17 = arith.constant 0 : index
      %c0_18 = arith.constant 0 : index
      %37 = vector.load %arg2[%c4, %c0_17, %c0_18] : memref<9x8x4xbf16, #tpu.memory_space<vmem>>, vector<1x8x4xbf16>
      %38 = vector.shape_cast %37 : vector<1x8x4xbf16> to vector<8x4xbf16>
      %cst_19 = arith.constant dense<0.000000e+00> : vector<8x384xf32>
      %39 = tpu.matmul %38, %36, %cst_19 {dimension_numbers = #tpu.dot_dimension_numbers<[1], [0], [0], [1], [0, 0, 1, 1], [], []>} : vector<8x4xbf16>, vector<4x384xbf16>, vector<8x384xf32> -> vector<8x384xf32>
      %40 = arith.addf %34, %39 : vector<8x384xf32>
      %41 = vector.extract_strided_slice %11 {offsets = [0, 20], sizes = [4, 384], strides = [1, 1]} : vector<4x512xf32> to vector<4x384xf32>
      %42 = arith.truncf %41 : vector<4x384xf32> to vector<4x384xbf16>
      %c5 = arith.constant 5 : index
      %c0_20 = arith.constant 0 : index
      %c0_21 = arith.constant 0 : index
      %43 = vector.load %arg2[%c5, %c0_20, %c0_21] : memref<9x8x4xbf16, #tpu.memory_space<vmem>>, vector<1x8x4xbf16>
      %44 = vector.shape_cast %43 : vector<1x8x4xbf16> to vector<8x4xbf16>
      %cst_22 = arith.constant dense<0.000000e+00> : vector<8x384xf32>
      %45 = tpu.matmul %44, %42, %cst_22 {dimension_numbers = #tpu.dot_dimension_numbers<[1], [0], [0], [1], [0, 0, 1, 1], [], []>} : vector<8x4xbf16>, vector<4x384xbf16>, vector<8x384xf32> -> vector<8x384xf32>
      %46 = arith.addf %40, %45 : vector<8x384xf32>
      %47 = vector.extract_strided_slice %11 {offsets = [0, 36], sizes = [4, 384], strides = [1, 1]} : vector<4x512xf32> to vector<4x384xf32>
      %48 = arith.truncf %47 : vector<4x384xf32> to vector<4x384xbf16>
      %c6 = arith.constant 6 : index
      %c0_23 = arith.constant 0 : index
      %c0_24 = arith.constant 0 : index
      %49 = vector.load %arg2[%c6, %c0_23, %c0_24] : memref<9x8x4xbf16, #tpu.memory_space<vmem>>, vector<1x8x4xbf16>
      %50 = vector.shape_cast %49 : vector<1x8x4xbf16> to vector<8x4xbf16>
      %cst_25 = arith.constant dense<0.000000e+00> : vector<8x384xf32>
      %51 = tpu.matmul %50, %48, %cst_25 {dimension_numbers = #tpu.dot_dimension_numbers<[1], [0], [0], [1], [0, 0, 1, 1], [], []>} : vector<8x4xbf16>, vector<4x384xbf16>, vector<8x384xf32> -> vector<8x384xf32>
      %52 = arith.addf %46, %51 : vector<8x384xf32>
      %53 = vector.extract_strided_slice %11 {offsets = [0, 37], sizes = [4, 384], strides = [1, 1]} : vector<4x512xf32> to vector<4x384xf32>
      %54 = arith.truncf %53 : vector<4x384xf32> to vector<4x384xbf16>
      %c7 = arith.constant 7 : index
      %c0_26 = arith.constant 0 : index
      %c0_27 = arith.constant 0 : index
      %55 = vector.load %arg2[%c7, %c0_26, %c0_27] : memref<9x8x4xbf16, #tpu.memory_space<vmem>>, vector<1x8x4xbf16>
      %56 = vector.shape_cast %55 : vector<1x8x4xbf16> to vector<8x4xbf16>
      %cst_28 = arith.constant dense<0.000000e+00> : vector<8x384xf32>
      %57 = tpu.matmul %56, %54, %cst_28 {dimension_numbers = #tpu.dot_dimension_numbers<[1], [0], [0], [1], [0, 0, 1, 1], [], []>} : vector<8x4xbf16>, vector<4x384xbf16>, vector<8x384xf32> -> vector<8x384xf32>
      %58 = arith.addf %52, %57 : vector<8x384xf32>
      %59 = vector.extract_strided_slice %11 {offsets = [0, 38], sizes = [4, 384], strides = [1, 1]} : vector<4x512xf32> to vector<4x384xf32>
      %60 = arith.truncf %59 : vector<4x384xf32> to vector<4x384xbf16>
      %c8 = arith.constant 8 : index
      %c0_29 = arith.constant 0 : index
      %c0_30 = arith.constant 0 : index
      %61 = vector.load %arg2[%c8, %c0_29, %c0_30] : memref<9x8x4xbf16, #tpu.memory_space<vmem>>, vector<1x8x4xbf16>
      %62 = vector.shape_cast %61 : vector<1x8x4xbf16> to vector<8x4xbf16>
      %cst_31 = arith.constant dense<0.000000e+00> : vector<8x384xf32>
      %63 = tpu.matmul %62, %60, %cst_31 {dimension_numbers = #tpu.dot_dimension_numbers<[1], [0], [0], [1], [0, 0, 1, 1], [], []>} : vector<8x4xbf16>, vector<4x384xbf16>, vector<8x384xf32> -> vector<8x384xf32>
      %64 = arith.addf %58, %63 : vector<8x384xf32>
      %c0_32 = arith.constant 0 : index
      %c0_33 = arith.constant 0 : index
      %65 = vector.load %arg3[%c0_32, %c0_33] : memref<8x1xf32, #tpu.memory_space<vmem>>, vector<8x1xf32>
      %66 = vector.broadcast %65 : vector<8x1xf32> to vector<8x384xf32>
      %67 = arith.addf %64, %66 : vector<8x384xf32>
      %68 = arith.truncf %67 : vector<8x384xf32> to vector<8x384xbf16>
      %c3_i32 = arith.constant 3 : i32
      %c0_i32_34 = arith.constant 0 : i32
      %69 = arith.cmpi eq, %c3_i32, %c0_i32_34 : i32
      %c1_i32_35 = arith.constant 1 : i32
      %70 = arith.select %69, %c1_i32_35, %c3_i32 : i32
      %71 = arith.remsi %arg0, %70 : i32
      %c0_i32_36 = arith.constant 0 : i32
      %72 = arith.cmpi ne, %71, %c0_i32_36 : i32
      %c0_i32_37 = arith.constant 0 : i32
      %73 = arith.cmpi slt, %71, %c0_i32_37 : i32
      %c0_i32_38 = arith.constant 0 : i32
      %74 = arith.cmpi slt, %70, %c0_i32_38 : i32
      %75 = arith.xori %73, %74 : i1
      %76 = arith.andi %75, %72 : i1
      %77 = arith.addi %71, %70 : i32
      %78 = arith.select %76, %77, %71 : i32
      %79 = arith.index_cast %78 : i32 to index
      %c0_39 = arith.constant 0 : index
      %c0_40 = arith.constant 0 : index
      %80 = vector.load %arg6[%79, %c0_39, %c0_40] : memref<3x8x384xbf16, #tpu.memory_space<vmem>>, vector<1x8x384xbf16>
      %81 = vector.shape_cast %80 : vector<1x8x384xbf16> to vector<8x384xbf16>
      %82 = vector.shape_cast %68 : vector<8x384xbf16> to vector<1x8x384xbf16>
      tpu.vector_store %arg6[%79, %c0_39, %c0_40], %82 {strides = array<i32>} : memref<3x8x384xbf16, #tpu.memory_space<vmem>>, vector<1x8x384xbf16>,
    } else {
    }
    %c1_i32 = arith.constant 1 : i32
    %6 = arith.cmpi sge, %arg0, %c1_i32 : i32
    %7 = arith.extui %6 : i1 to i32
    %c0_i32_2 = arith.constant 0 : i32
    %8 = arith.cmpi ne, %7, %c0_i32_2 : i32
    scf.if %8 {
      %c0 = arith.constant 0 : index
      %c0_3 = arith.constant 0 : index
      %c0_4 = arith.constant 0 : index
      %9 = vector.load %arg4[%c0, %c0_3, %c0_4] : memref<3x8x8xbf16, #tpu.memory_space<vmem>>, vector<3x8x8xbf16>
      %c0_i32_5 = arith.constant 0 : i32
      %10 = arith.addi %arg0, %c0_i32_5 : i32
      %c2_i32 = arith.constant 2 : i32
      %11 = arith.subi %10, %c2_i32 : i32
      %c0_i32_6 = arith.constant 0 : i32
      %12 = arith.cmpi sge, %11, %c0_i32_6 : i32
      %c3_i32 = arith.constant 3 : i32
      %13 = arith.cmpi sle, %11, %c3_i32 : i32
      %14 = arith.andi %12, %13 : i1
      %15 = vector.extract_strided_slice %9 {offsets = [0, 0, 0], sizes = [1, 8, 8], strides = [1, 1, 1]} : vector<3x8x8xbf16> to vector<1x8x8xbf16>
      %16 = vector.shape_cast %15 : vector<1x8x8xbf16> to vector<8x8xbf16>
      %17 = arith.extui %14 : i1 to i32
      %18 = arith.sitofp %17 : i32 to f32
      %19 = arith.truncf %18 : f32 to bf16
      %20 = vector.broadcast %19 : bf16 to vector<8x8xbf16>
      %21 = arith.mulf %16, %20 : vector<8x8xbf16>
      %c0_i32_7 = arith.constant 0 : i32
      %22 = arith.addi %arg0, %c0_i32_7 : i32
      %c1_i32_8 = arith.constant 1 : i32
      %23 = arith.addi %22, %c1_i32_8 : i32
      %c3_i32_9 = arith.constant 3 : i32
      %c0_i32_10 = arith.constant 0 : i32
      %24 = arith.cmpi eq, %c3_i32_9, %c0_i32_10 : i32
      %c1_i32_11 = arith.constant 1 : i32
      %25 = arith.select %24, %c1_i32_11, %c3_i32_9 : i32
      %26 = arith.remsi %23, %25 : i32
      %c0_i32_12 = arith.constant 0 : i32
      %27 = arith.cmpi ne, %26, %c0_i32_12 : i32
      %c0_i32_13 = arith.constant 0 : i32
      %28 = arith.cmpi slt, %26, %c0_i32_13 : i32
      %c0_i32_14 = arith.constant 0 : i32
      %29 = arith.cmpi slt, %25, %c0_i32_14 : i32
      %30 = arith.xori %28, %29 : i1
      %31 = arith.andi %30, %27 : i1
      %32 = arith.addi %26, %25 : i32
      %33 = arith.select %31, %32, %26 : i32
      %34 = arith.index_cast %33 : i32 to index
      %c0_15 = arith.constant 0 : index
      %c0_16 = arith.constant 0 : index
      %35 = vector.load %arg6[%34, %c0_15, %c0_16] : memref<3x8x384xbf16, #tpu.memory_space<vmem>>, vector<1x8x384xbf16>
      %36 = vector.shape_cast %35 : vector<1x8x384xbf16> to vector<8x384xbf16>
      %cst = arith.constant dense<0.000000e+00> : vector<8x384xf32>
      %37 = tpu.matmul %21, %36, %cst {dimension_numbers = #tpu.dot_dimension_numbers<[1], [0], [0], [1], [0, 0, 1, 1], [], []>} : vector<8x8xbf16>, vector<8x384xbf16>, vector<8x384xf32> -> vector<8x384xf32>
      %c1_i32_17 = arith.constant 1 : i32
      %38 = arith.addi %arg0, %c1_i32_17 : i32
      %c2_i32_18 = arith.constant 2 : i32
      %39 = arith.subi %38, %c2_i32_18 : i32
      %c0_i32_19 = arith.constant 0 : i32
      %40 = arith.cmpi sge, %39, %c0_i32_19 : i32
      %c3_i32_20 = arith.constant 3 : i32
      %41 = arith.cmpi sle, %39, %c3_i32_20 : i32
      %42 = arith.andi %40, %41 : i1
      %43 = vector.extract_strided_slice %9 {offsets = [1, 0, 0], sizes = [1, 8, 8], strides = [1, 1, 1]} : vector<3x8x8xbf16> to vector<1x8x8xbf16>
      %44 = vector.shape_cast %43 : vector<1x8x8xbf16> to vector<8x8xbf16>
      %45 = arith.extui %42 : i1 to i32
      %46 = arith.sitofp %45 : i32 to f32
      %47 = arith.truncf %46 : f32 to bf16
      %48 = vector.broadcast %47 : bf16 to vector<8x8xbf16>
      %49 = arith.mulf %44, %48 : vector<8x8xbf16>
      %c1_i32_21 = arith.constant 1 : i32
      %50 = arith.addi %arg0, %c1_i32_21 : i32
      %c1_i32_22 = arith.constant 1 : i32
      %51 = arith.addi %50, %c1_i32_22 : i32
      %c3_i32_23 = arith.constant 3 : i32
      %c0_i32_24 = arith.constant 0 : i32
      %52 = arith.cmpi eq, %c3_i32_23, %c0_i32_24 : i32
      %c1_i32_25 = arith.constant 1 : i32
      %53 = arith.select %52, %c1_i32_25, %c3_i32_23 : i32
      %54 = arith.remsi %51, %53 : i32
      %c0_i32_26 = arith.constant 0 : i32
      %55 = arith.cmpi ne, %54, %c0_i32_26 : i32
      %c0_i32_27 = arith.constant 0 : i32
      %56 = arith.cmpi slt, %54, %c0_i32_27 : i32
      %c0_i32_28 = arith.constant 0 : i32
      %57 = arith.cmpi slt, %53, %c0_i32_28 : i32
      %58 = arith.xori %56, %57 : i1
      %59 = arith.andi %58, %55 : i1
      %60 = arith.addi %54, %53 : i32
      %61 = arith.select %59, %60, %54 : i32
      %62 = arith.index_cast %61 : i32 to index
      %c0_29 = arith.constant 0 : index
      %c0_30 = arith.constant 0 : index
      %63 = vector.load %arg6[%62, %c0_29, %c0_30] : memref<3x8x384xbf16, #tpu.memory_space<vmem>>, vector<1x8x384xbf16>
      %64 = vector.shape_cast %63 : vector<1x8x384xbf16> to vector<8x384xbf16>
      %cst_31 = arith.constant dense<0.000000e+00> : vector<8x384xf32>
      %65 = tpu.matmul %49, %64, %cst_31 {dimension_numbers = #tpu.dot_dimension_numbers<[1], [0], [0], [1], [0, 0, 1, 1], [], []>} : vector<8x8xbf16>, vector<8x384xbf16>, vector<8x384xf32> -> vector<8x384xf32>
      %66 = arith.addf %37, %65 : vector<8x384xf32>
      %c2_i32_32 = arith.constant 2 : i32
      %67 = arith.addi %arg0, %c2_i32_32 : i32
      %c2_i32_33 = arith.constant 2 : i32
      %68 = arith.subi %67, %c2_i32_33 : i32
      %c0_i32_34 = arith.constant 0 : i32
      %69 = arith.cmpi sge, %68, %c0_i32_34 : i32
      %c3_i32_35 = arith.constant 3 : i32
      %70 = arith.cmpi sle, %68, %c3_i32_35 : i32
      %71 = arith.andi %69, %70 : i1
      %72 = vector.extract_strided_slice %9 {offsets = [2, 0, 0], sizes = [1, 8, 8], strides = [1, 1, 1]} : vector<3x8x8xbf16> to vector<1x8x8xbf16>
      %73 = vector.shape_cast %72 : vector<1x8x8xbf16> to vector<8x8xbf16>
      %74 = arith.extui %71 : i1 to i32
      %75 = arith.sitofp %74 : i32 to f32
      %76 = arith.truncf %75 : f32 to bf16
      %77 = vector.broadcast %76 : bf16 to vector<8x8xbf16>
      %78 = arith.mulf %73, %77 : vector<8x8xbf16>
      %c2_i32_36 = arith.constant 2 : i32
      %79 = arith.addi %arg0, %c2_i32_36 : i32
      %c1_i32_37 = arith.constant 1 : i32
      %80 = arith.addi %79, %c1_i32_37 : i32
      %c3_i32_38 = arith.constant 3 : i32
      %c0_i32_39 = arith.constant 0 : i32
      %81 = arith.cmpi eq, %c3_i32_38, %c0_i32_39 : i32
      %c1_i32_40 = arith.constant 1 : i32
      %82 = arith.select %81, %c1_i32_40, %c3_i32_38 : i32
      %83 = arith.remsi %80, %82 : i32
      %c0_i32_41 = arith.constant 0 : i32
      %84 = arith.cmpi ne, %83, %c0_i32_41 : i32
      %c0_i32_42 = arith.constant 0 : i32
      %85 = arith.cmpi slt, %83, %c0_i32_42 : i32
      %c0_i32_43 = arith.constant 0 : i32
      %86 = arith.cmpi slt, %82, %c0_i32_43 : i32
      %87 = arith.xori %85, %86 : i1
      %88 = arith.andi %87, %84 : i1
      %89 = arith.addi %83, %82 : i32
      %90 = arith.select %88, %89, %83 : i32
      %91 = arith.index_cast %90 : i32 to index
      %c0_44 = arith.constant 0 : index
      %c0_45 = arith.constant 0 : index
      %92 = vector.load %arg6[%91, %c0_44, %c0_45] : memref<3x8x384xbf16, #tpu.memory_space<vmem>>, vector<1x8x384xbf16>
      %93 = vector.shape_cast %92 : vector<1x8x384xbf16> to vector<8x384xbf16>
      %cst_46 = arith.constant dense<0.000000e+00> : vector<8x384xf32>
      %94 = tpu.matmul %78, %93, %cst_46 {dimension_numbers = #tpu.dot_dimension_numbers<[1], [0], [0], [1], [0, 0, 1, 1], [], []>} : vector<8x8xbf16>, vector<8x384xbf16>, vector<8x384xf32> -> vector<8x384xf32>
      %95 = arith.addf %66, %94 : vector<8x384xf32>
      %96 = arith.truncf %95 : vector<8x384xf32> to vector<8x384xbf16>
      %c0_47 = arith.constant 0 : index
      %c0_48 = arith.constant 0 : index
      %c0_49 = arith.constant 0 : index
      %97 = vector.load %arg5[%c0_47, %c0_48, %c0_49] : memref<1x8x384xbf16, #tpu.memory_space<vmem>>, vector<1x8x384xbf16>
      %98 = vector.shape_cast %97 : vector<1x8x384xbf16> to vector<8x384xbf16>
      %99 = vector.shape_cast %96 : vector<8x384xbf16> to vector<1x8x384xbf16>
      tpu.vector_store %arg5[%c0_47, %c0_48, %c0_49], %99 {strides = array<i32>} : memref<1x8x384xbf16, #tpu.memory_space<vmem>>, vector<1x8x384xbf16>,
    } else {
    }
    return
  }
  func.func @transform_0(%arg0: i32) -> (i32, i32, i32) {
    %c3_i32 = arith.constant 3 : i32
    %0 = arith.minsi %arg0, %c3_i32 : i32
    %c0_i32 = arith.constant 0 : i32
    %c0_i32_0 = arith.constant 0 : i32
    %c0_i32_1 = arith.constant 0 : i32
    return %0, %c0_i32, %c0_i32_0 : i32, i32, i32
  }
  func.func @transform_1(%arg0: i32) -> (i32, i32, i32) {
    %c0_i32 = arith.constant 0 : i32
    %c0_i32_0 = arith.constant 0 : i32
    %c0_i32_1 = arith.constant 0 : i32
    %c0_i32_2 = arith.constant 0 : i32
    return %c0_i32, %c0_i32_0, %c0_i32_1 : i32, i32, i32
  }
  func.func @transform_2(%arg0: i32) -> (i32, i32) {
    %c0_i32 = arith.constant 0 : i32
    %c0_i32_0 = arith.constant 0 : i32
    %c0_i32_1 = arith.constant 0 : i32
    return %c0_i32, %c0_i32_0 : i32, i32
  }
  func.func @transform_3(%arg0: i32) -> (i32, i32, i32) {
    %c0_i32 = arith.constant 0 : i32
    %c0_i32_0 = arith.constant 0 : i32
    %c0_i32_1 = arith.constant 0 : i32
    %c0_i32_2 = arith.constant 0 : i32
    return %c0_i32, %c0_i32_0, %c0_i32_1 : i32, i32, i32
  }
  func.func @transform_4(%arg0: i32) -> (i32, i32, i32) {
    %c1_i32 = arith.constant 1 : i32
    %0 = arith.subi %arg0, %c1_i32 : i32
    %c0_i32 = arith.constant 0 : i32
    %1 = arith.maxsi %0, %c0_i32 : i32
    %c0_i32_0 = arith.constant 0 : i32
    %c0_i32_1 = arith.constant 0 : i32
    %c0_i32_2 = arith.constant 0 : i32
    return %1, %c0_i32_0, %c0_i32_1 : i32, i32, i32
  }
}

</mosaic_0001>

<bundles_post_ra>
// kernel: convnext_conv2p1d.1
= control target key start
LH: loop header
LB: loop body
LE: loop exit
PB: predicated region body
PF: predicated region fallthrough
CT: control target
= control target key end

     0   :  { %s2115_s15 = smov 0   ;;  %s2371_s0 = inlined_call_operand.vmem [shape: bf16[4,4,512], index: 0, kind: input, shape index: {}]   ;;  %s2372_s1 = inlined_call_operand.vmem [shape: bf16[9,8,4], index: 1, kind: input, shape index: {}]   ;;  %s2373_s2 = inlined_call_operand.vmem [shape: f32[8,1], index: 2, kind: input, shape index: {}]   ;;  %s2374_s3 = inlined_call_operand.vmem [shape: bf16[3,8,8], index: 3, kind: input, shape index: {}]   ;;  %s2375_s4 = inlined_call_operand.vmem [shape: bf16[4,8,384], index: 4, kind: output, shape index: {}]  }
   0x1 LB: > { %s2121_s16 = sadd.s32 4294967295, %s2073_s15   ;;  %p1802_p0 = scmp.ge.s32.totalorder %s2073_s15, 1  ;;  %s2073_s15 = sphi %s2115_s15, %s14_s15  }
   0x2   : > { %p176_p1 = scmp.lt.s32.totalorder %s2073_s15, 6 }
   0x4   : > { %p177_p2 = pnand %p1802_p0, %p176_p1 }
   0x5   : > { %p207_p3 = scmp.lt.s32.totalorder (!%p177_p2), %s2121_s16, 3  ;;  %s2127_s17 = sadd.s32 (!%p177_p2), 4294967295, %s2121_s16 }
   0x6   : > { %180 = sbr.rel (%p177_p2) target bundleno = 704 (0x2c0), region = 36  ;;  %p217_p4 = scmp.gt.s32.totalorder (!%p177_p2), %s2127_s17, 0 }
   0x7   : > { %p1809_p5 = scmp.lt.s32.totalorder (!%p177_p2), %s2127_s17, 3  ;;  %p1815_p6 = scmp.ne.s32.totalorder (!%p177_p2), %s2121_s16, 0 }
   0xd   : > { %s208_s18 = scalar_select %p207_p3, %s2121_s16, 3 }
   0xe   : > { %s218_s19 = scalar_select %p217_p4, %s2127_s17, 0 }
   0xf   : > { %s2379_s18 = smov (!%p207_p3, %s208_s18), 3  ;;  %231 = sbr.rel (%p1815_p6) target bundleno = 22 (0x16), region = 40 }
  0x10   : > { %s2381_s19 = smov (!%p1809_p5, %s218_s19), 3  ;;  %s1898_s20 = sshll.u32 %s2379_s18, 3  ;;  %v2075_v0 = vmov (!%p1815_p6), 0  }
  0x11   : > { %s213_s23 = scalar_lea.vmem %s2371_s0, %s1898_s20  ;;  %s2021_s24 = smul.u32 12, %s2381_s19  ;;  %232 = vst [vmem:[#allocation2] sm:$0xff] (!%p1815_p6), %v2075_v0  ;;  %233 = vst [vmem:[#allocation2 + $0x8] sm:$0xf] (!%p1815_p6), %v2075_v0 }
  0x12   : > { %234 = vst [vmem:[#allocation2 + $0xc] sm:$0xff] (!%p1815_p6), %v2075_v0  ;;  %235 = vst [vmem:[#allocation2 + $0x14] sm:$0xf] (!%p1815_p6), %v2075_v0 }
  0x13   : > { %s2139_s27 = scalar_lea.vmem %s2375_s4, %s2021_s24  ;;  %236 = vst [vmem:[#allocation2 + $0x18] sm:$0xff] (!%p1815_p6), %v2075_v0  ;;  %237 = vst [vmem:[#allocation2 + $0x20] sm:$0xf] (!%p1815_p6), %v2075_v0 }
  0x16 PF: > { %p1816_p7 = scmp.ge.s32.totalorder %s2121_s16, 4 }
  0x17   : > { %v242_v1 = vld [vmem:[%s213_s23] sm:$0xff] (!%p1816_p7)  ;;  %v2076_v6 = vmov (!%p1816_p7), 0.0   ;;  %s2077_s28 = smov (!%p1816_p7), 127   ;;  %v2078_v9 = vmov (!%p1816_p7), 0   ;;  %vm2079_vm0 = vmmov (!%p1816_p7), 0   ;;  %s2080_s29 = smov (!%p1816_p7), 126  }
  0x18   : > { %241 = sbr.rel (%p1816_p7) target bundleno = 434 (0x1b2), region = 44  ;;  %v2143_v2 = vcombine.high (!%p1816_p7), %v242_v1, %v242_v1  ;;  %v2145_v3 = vcombine.low (!%p1816_p7), %v242_v1, %v242_v1  ;;  %v244_v4 = vunpack.c.h.bf16 (!%p1816_p7), %v242_v1  ;;  %v243_v5 = vunpack.c.l.bf16 (!%p1816_p7), %v242_v1  ;;  %1933 = vmatprep.subr.bf16.mxu1 (!%p1816_p7), %v2076_v6  ;;  %320 = vmatprep.mubr.bf16.mxu0 (!%p1816_p7), %v2078_v9  ;;  %s2081_s30 = smov (!%p1816_p7), 110   ;;  %v1232_v12 = vld [vmem:[%s2373_s2] sm:$0xff] (!%p1816_p7)  ;;  %v1826_v42 = vld [vmem:[%s2372_s1 + $0x8] sm:$0xf] (!%p1816_p7) }
  0x19   : > { %1935 = vmatprep.mubr.msk.bf16.mxu1 (!%p1816_p7), %vm2079_vm0, %v2076_v6  ;;  %2047 = vset.pattern.permute.xlu0 (!%p1816_p7), %v2078_v9  ;;  %s2082_s5 = smov (!%p1816_p7), 109   ;;  %s2083_s6 = smov (!%p1816_p7), 108   ;;  %vm270_vm1 = vcmask (!%p1816_p7), 1039360   ;;  %vm278_vm2 = vcmask (!%p1816_p7), 1041408   ;;  %v1819_v22 = vld [vmem:[%s2372_s1 + $0x4] sm:$0xf] (!%p1816_p7) }
  0x1a   : > { %266 = vrot.lane.b32.xlu1 (!%p1816_p7), %v2143_v2, %s2077_s28  ;;  %262 = vrot.lane.b32.xlu0 (!%p1816_p7), %v2145_v3, %s2077_s28  ;;  %v253_v7 = vcombine.high (!%p1816_p7), %v244_v4, %v244_v4  ;;  %v247_v8 = vcombine.high (!%p1816_p7), %v243_v5, %v243_v5  ;;  %s2084_s7 = smov (!%p1816_p7), 92   ;;  %s2085_s8 = smov (!%p1816_p7), 91   ;;  %vm274_vm3 = vcmask (!%p1816_p7), 31744   ;;  %v373_v24 = vsel (!%p1816_p7), %vm278_vm2, %v2145_v3, 0  ;;  %v252_v32 = vld [vmem:[%s2372_s1] sm:$0xf] (!%p1816_p7) }
  0x1b   : > { %s2086_s9 = smov (!%p1816_p7), 90   ;;  %v379_v25 = vsel (!%p1816_p7), %vm278_vm2, %v2143_v2, 0  ;;  %vm472_vm4 = vcmask (!%p1816_p7), 1031168   ;;  %vm582_vm5 = vcmask (!%p1816_p7), 900096   ;;  %vm692_vm6 = vcmask (!%p1816_p7), 891904   ;;  %p1244_p8 = scmp.lt.s32.totalorder (!%p1816_p7), %s2121_s16, 0 }
  0x1c   : > { %v255_v10 = vpack.c.bf16 (!%p1816_p7), %v253_v7, %v253_v7  ;;  %v250_v11 = vpack.c.bf16 (!%p1816_p7), %v247_v8, %v247_v8  ;;  %v1830_v52 = vld [vmem:[%s2372_s1 + $0xc] sm:$0xf] (!%p1816_p7)  ;;  %vm802_vm7 = vcmask (!%p1816_p7), 883712   ;;  %v1834_v62 = vld [vmem:[%s2372_s1 + $0x10] sm:$0xf] (!%p1816_p7)  ;;  %vm912_vm8 = vcmask (!%p1816_p7), 752640  }
  0x1d   : > { %vm1022_vm9 = vcmask (!%p1816_p7), 744448   ;;  %vm1132_vm10 = vcmask (!%p1816_p7), 736256  }
  0x1e   : > { %268 = vrot.lane.b32.xlu1 (!%p1816_p7), %v255_v10, %s2077_s28  ;;  %264 = vrot.lane.b32.xlu0 (!%p1816_p7), %v250_v11, %s2077_s28 }
  0x22   : > { %464 = vrot.lane.b32.xlu0 %v2145_v3, %s2080_s29  ;;  %466 = vrot.lane.b32.xlu1 %v250_v11, %s2080_s29 }
  0x26   : > { %468 = vrot.lane.b32.xlu0 %v2143_v2, %s2080_s29  ;;  %470 = vrot.lane.b32.xlu1 %v255_v10, %s2080_s29 }
  0x2a   : > { %574 = vrot.lane.b32.xlu0 %v2145_v3, %s2081_s30  ;;  %576 = vrot.lane.b32.xlu1 %v250_v11, %s2081_s30 }
  0x2e   : > { %578 = vrot.lane.b32.xlu0 %v2143_v2, %s2081_s30  ;;  %580 = vrot.lane.b32.xlu1 %v255_v10, %s2081_s30 }
  0x32   : > { %684 = vrot.lane.b32.xlu0 %v2145_v3, %s2082_s5  ;;  %686 = vrot.lane.b32.xlu1 %v250_v11, %s2082_s5 }
  0x36   : > { %688 = vrot.lane.b32.xlu0 %v2143_v2, %s2082_s5  ;;  %690 = vrot.lane.b32.xlu1 %v255_v10, %s2082_s5 }
  0x3a   : > { %794 = vrot.lane.b32.xlu0 %v2145_v3, %s2083_s6  ;;  %796 = vrot.lane.b32.xlu1 %v250_v11, %s2083_s6 }
  0x3e   : > { %798 = vrot.lane.b32.xlu0 %v2143_v2, %s2083_s6  ;;  %800 = vrot.lane.b32.xlu1 %v255_v10, %s2083_s6 }
  0x42   : > { %904 = vrot.lane.b32.xlu0 %v2145_v3, %s2084_s7  ;;  %906 = vrot.lane.b32.xlu1 %v250_v11, %s2084_s7 }
  0x46   : > { %908 = vrot.lane.b32.xlu0 %v2143_v2, %s2084_s7  ;;  %910 = vrot.lane.b32.xlu1 %v255_v10, %s2084_s7 }
  0x4a   : > { %1014 = vrot.lane.b32.xlu0 %v2145_v3, %s2085_s8  ;;  %1016 = vrot.lane.b32.xlu1 %v250_v11, %s2085_s8 }
  0x4e   : > { %1018 = vrot.lane.b32.xlu0 %v2143_v2, %s2085_s8  ;;  %1020 = vrot.lane.b32.xlu1 %v255_v10, %s2085_s8  ;;  %s1245_s8 = ssub.s32 0, %s2121_s16 }
  0x52   : > { %1124 = vrot.lane.b32.xlu0 %v2145_v3, %s2086_s9  ;;  %1126 = vrot.lane.b32.xlu1 %v250_v11, %s2086_s9 }
  0x56   : > { %1128 = vrot.lane.b32.xlu0 %v2143_v2, %s2086_s9  ;;  %1130 = vrot.lane.b32.xlu1 %v255_v10, %s2086_s9  ;;  %v1838_v10 = vld [vmem:[%s2372_s1 + $0x14] sm:$0xf]  ;;  %s1854_s9 = smin.u32 %s2121_s16, %s1245_s8 }
  0x57   : > { %2050 = sdivrem.u32 %s1854_s9, 3 }
  0x5a   : > { %1235 = vperm.xlu0 %2047, %v1232_v12  }
  0x60   : > { %s2051_s10 = spop.drf %2050 }
  0x61   : > { %s1249_s11 = ssub.s32 0, %s2051_s10 }
  0x62   : > { %s2383_s11 = smov (!%p1244_p8, %s1249_s11), %s2051_s10 }
  0x63   : > { %p1856_p9 = scmp.lt.s32.totalorder %s2383_s11, 0  ;;  %s1255_s12 = sadd.s32 3, %s2383_s11 }
  0x65   : > { %s2385_s12 = smov (!%p1856_p9, %s1255_s12), %s2383_s11 }
  0x66   : > { %s1903_s13 = smul.u32 12, %s2385_s12 }
  0x68   : > { %s1269_s14 = scalar_lea.vmem [#allocation2], %s1903_s13 }
  0x8c   : > { %v267_v13 = vpop.permute.xlu1 %266  ;;  %v263_v14 = vpop.permute.xlu0 %262 }
  0x90   : > { %v269_v15 = vpop.permute.xlu1 %268  ;;  %v265_v16 = vpop.permute.xlu0 %264 }
  0x91   : > { %v272_v17 = vsel %vm270_vm1, %v265_v16, %v267_v13  ;;  %v271_v18 = vsel %vm270_vm1, %v263_v14, %v265_v16  ;;  %v273_v19 = vsel %vm270_vm1, %v267_v13, %v269_v15 }
  0x92   : > { %1820 = vmatprep.subr.msk.bf16.mxu0 %vm278_vm2, %v272_v17  ;;  %v280_v20 = vsel %vm278_vm2, %v271_v18, 0  ;;  %v286_v21 = vsel %vm278_vm2, %v273_v19, 0 }
  0x93   : > { %289 = vmatpush1.bf16.msra.mxu0 %v280_v20  ;;  %1934 = vmatpush3.bf16.msra.mxu1 %v286_v21  ;;  %v1842_v20 = vld [vmem:[%s2372_s1 + $0x18] sm:$0xf] }
  0x94   : > { %v465_v23 = vpop.permute.xlu0 %464  ;;  %1823 = vmatprep.subr.msk.bf16.mxu0 %vm278_vm2, %v250_v11  ;;  %1939 = vmatprep.subr.bf16.mxu1 %v2076_v6  ;;  %v467_v26 = vpop.permute.xlu1 %466 }
  0x95   : > { %v473_v29 = vsel %vm472_vm4, %v465_v23, %v467_v26 }
  0x96   : > { %1821 = vmatmul.mubr.msk.bf16.vlgmr.msra.gmra.mrb[0].mxu0 %vm274_vm3, %v1819_v22  ;;  %1936 = vmatmul.mubr.msk.bf16.vlgmr.msra.gmra.mrb[0].mxu1 %vm274_vm3, %v1819_v22  ;;  %v480_v33 = vsel %vm278_vm2, %v473_v29, 0 }
  0x97   : > { %382 = vmatpush1.bf16.msra.mxu0 %v373_v24  ;;  %1940 = vmatpush3.bf16.msra.mxu1 %v379_v25 }
  0x98   : > { %v469_v27 = vpop.permute.xlu0 %468  ;;  %v471_v28 = vpop.permute.xlu1 %470  ;;  %413 = vmatprep.mubr.bf16.mxu0 %v2078_v9  ;;  %1941 = vmatprep.mubr.msk.bf16.mxu1 %vm2079_vm0, %v2076_v6 }
  0x99   : > { %v474_v30 = vsel %vm472_vm4, %v467_v26, %v469_v27  ;;  %v475_v31 = vsel %vm472_vm4, %v469_v27, %v471_v28  ;;  %1945 = vmatprep.subr.bf16.mxu1 %v2076_v6 }
  0x9a   : > { %1827 = vmatprep.subr.msk.bf16.mxu0 %vm278_vm2, %v474_v30  ;;  %v486_v34 = vsel %vm278_vm2, %v475_v31, 0  ;;  %v1846_v30 = vld [vmem:[%s2372_s1 + $0x1c] sm:$0xf] }
  0x9c   : > { %v575_v35 = vpop.permute.xlu0 %574  ;;  %v577_v36 = vpop.permute.xlu1 %576 }
  0x9d   : > { %v583_v39 = vsel %vm582_vm5, %v575_v35, %v577_v36 }
  0x9e   : > { %1824 = vmatmul.mubr.msk.bf16.vlgmr.msra.gmra.mrb[4].mxu0 %vm274_vm3, %v252_v32  ;;  %1942 = vmatmul.mubr.msk.bf16.vlgmr.msra.gmra.mrb[4].mxu1 %vm274_vm3, %v252_v32  ;;  %v590_v43 = vsel %vm278_vm2, %v583_v39, 0 }
  0x9f   : > { %489 = vmatpush1.bf16.msra.mxu0 %v480_v33  ;;  %1946 = vmatpush3.bf16.msra.mxu1 %v486_v34  ;;  %v1850_v33 = vld [vmem:[%s2372_s1 + $0x20] sm:$0xf] }
  0xa0   : > { %v579_v37 = vpop.permute.xlu0 %578  ;;  %v581_v38 = vpop.permute.xlu1 %580  ;;  %520 = vmatprep.mubr.bf16.mxu0 %v2078_v9  ;;  %1947 = vmatprep.mubr.msk.bf16.mxu1 %vm2079_vm0, %v2076_v6 }
  0xa1   : > { %v584_v40 = vsel %vm582_vm5, %v577_v36, %v579_v37  ;;  %v585_v41 = vsel %vm582_vm5, %v579_v37, %v581_v38  ;;  %1951 = vmatprep.subr.bf16.mxu1 %v2076_v6 }
  0xa2   : > { %1831 = vmatprep.subr.msk.bf16.mxu0 %vm278_vm2, %v584_v40  ;;  %v596_v44 = vsel %vm278_vm2, %v585_v41, 0 }
  0xa4   : > { %v685_v45 = vpop.permute.xlu0 %684  ;;  %v687_v46 = vpop.permute.xlu1 %686 }
  0xa5   : > { %v693_v49 = vsel %vm692_vm6, %v685_v45, %v687_v46 }
  0xa6   : > { %1828 = vmatmul.mubr.msk.bf16.vlgmr.msra.gmra.mrb[8].mxu0 %vm274_vm3, %v1826_v42  ;;  %1948 = vmatmul.mubr.msk.bf16.vlgmr.msra.gmra.mrb[8].mxu1 %vm274_vm3, %v1826_v42  ;;  %v700_v53 = vsel %vm278_vm2, %v693_v49, 0 }
  0xa7   : > { %599 = vmatpush1.bf16.msra.mxu0 %v590_v43  ;;  %1952 = vmatpush3.bf16.msra.mxu1 %v596_v44 }
  0xa8   : > { %v689_v47 = vpop.permute.xlu0 %688  ;;  %v691_v48 = vpop.permute.xlu1 %690  ;;  %630 = vmatprep.mubr.bf16.mxu0 %v2078_v9  ;;  %1953 = vmatprep.mubr.msk.bf16.mxu1 %vm2079_vm0, %v2076_v6 }
  0xa9   : > { %v694_v50 = vsel %vm692_vm6, %v687_v46, %v689_v47  ;;  %v695_v51 = vsel %vm692_vm6, %v689_v47, %v691_v48  ;;  %1957 = vmatprep.subr.bf16.mxu1 %v2076_v6 }
  0xaa   : > { %1835 = vmatprep.subr.msk.bf16.mxu0 %vm278_vm2, %v694_v50  ;;  %v706_v54 = vsel %vm278_vm2, %v695_v51, 0 }
  0xac   : > { %v795_v55 = vpop.permute.xlu0 %794  ;;  %v797_v56 = vpop.permute.xlu1 %796 }
  0xad   : > { %v803_v59 = vsel %vm802_vm7, %v795_v55, %v797_v56 }
  0xae   : > { %1832 = vmatmul.mubr.msk.bf16.vlgmr.msra.gmra.mrb[12].mxu0 %vm274_vm3, %v1830_v52  ;;  %1954 = vmatmul.mubr.msk.bf16.vlgmr.msra.gmra.mrb[12].mxu1 %vm274_vm3, %v1830_v52  ;;  %v810_v63 = vsel %vm278_vm2, %v803_v59, 0 }
  0xaf   : > { %709 = vmatpush1.bf16.msra.mxu0 %v700_v53  ;;  %1958 = vmatpush3.bf16.msra.mxu1 %v706_v54 }
  0xb0   : > { %v799_v57 = vpop.permute.xlu0 %798  ;;  %v801_v58 = vpop.permute.xlu1 %800  ;;  %740 = vmatprep.mubr.bf16.mxu0 %v2078_v9  ;;  %1959 = vmatprep.mubr.msk.bf16.mxu1 %vm2079_vm0, %v2076_v6 }
  0xb1   : > { %v804_v60 = vsel %vm802_vm7, %v797_v56, %v799_v57  ;;  %v805_v61 = vsel %vm802_vm7, %v799_v57, %v801_v58  ;;  %1963 = vmatprep.subr.bf16.mxu1 %v2076_v6 }
  0xb2   : > { %1839 = vmatprep.subr.msk.bf16.mxu0 %vm278_vm2, %v804_v60  ;;  %v816_v0 = vsel %vm278_vm2, %v805_v61, 0 }
  0xb4   : > { %v905_v1 = vpop.permute.xlu0 %904  ;;  %v907_v2 = vpop.permute.xlu1 %906 }
  0xb5   : > { %v913_v5 = vsel %vm912_vm8, %v905_v1, %v907_v2 }
  0xb6   : > { %1836 = vmatmul.mubr.msk.bf16.vlgmr.msra.gmra.mrb[16].mxu0 %vm274_vm3, %v1834_v62  ;;  %1960 = vmatmul.mubr.msk.bf16.vlgmr.msra.gmra.mrb[16].mxu1 %vm274_vm3, %v1834_v62  ;;  %v920_v11 = vsel %vm278_vm2, %v913_v5, 0 }
  0xb7   : > { %819 = vmatpush1.bf16.msra.mxu0 %v810_v63  ;;  %1964 = vmatpush3.bf16.msra.mxu1 %v816_v0 }
  0xb8   : > { %v909_v3 = vpop.permute.xlu0 %908  ;;  %v911_v4 = vpop.permute.xlu1 %910  ;;  %850 = vmatprep.mubr.bf16.mxu0 %v2078_v9  ;;  %1965 = vmatprep.mubr.msk.bf16.mxu1 %vm2079_vm0, %v2076_v6 }
  0xb9   : > { %v914_v7 = vsel %vm912_vm8, %v907_v2, %v909_v3  ;;  %v915_v8 = vsel %vm912_vm8, %v909_v3, %v911_v4  ;;  %1969 = vmatprep.subr.bf16.mxu1 %v2076_v6 }
  0xba   : > { %1843 = vmatprep.subr.msk.bf16.mxu0 %vm278_vm2, %v914_v7  ;;  %v926_v12 = vsel %vm278_vm2, %v915_v8, 0 }
  0xbc   : > { %v1015_v13 = vpop.permute.xlu0 %1014  ;;  %v1017_v14 = vpop.permute.xlu1 %1016 }
  0xbd   : > { %v1023_v17 = vsel %vm1022_vm9, %v1015_v13, %v1017_v14 }
  0xbe   : > { %1840 = vmatmul.mubr.msk.bf16.vlgmr.msra.gmra.mrb[20].mxu0 %vm274_vm3, %v1838_v10  ;;  %1966 = vmatmul.mubr.msk.bf16.vlgmr.msra.gmra.mrb[20].mxu1 %vm274_vm3, %v1838_v10  ;;  %v1030_v21 = vsel %vm278_vm2, %v1023_v17, 0 }
  0xbf   : > { %929 = vmatpush1.bf16.msra.mxu0 %v920_v11  ;;  %1970 = vmatpush3.bf16.msra.mxu1 %v926_v12 }
  0xc0   : > { %v1019_v15 = vpop.permute.xlu0 %1018  ;;  %v1021_v16 = vpop.permute.xlu1 %1020  ;;  %960 = vmatprep.mubr.bf16.mxu0 %v2078_v9  ;;  %1971 = vmatprep.mubr.msk.bf16.mxu1 %vm2079_vm0, %v2076_v6 }
  0xc1   : > { %v1024_v18 = vsel %vm1022_vm9, %v1017_v14, %v1019_v15  ;;  %v1025_v19 = vsel %vm1022_vm9, %v1019_v15, %v1021_v16  ;;  %1975 = vmatprep.subr.bf16.mxu1 %v2076_v6 }
  0xc2   : > { %1847 = vmatprep.subr.msk.bf16.mxu0 %vm278_vm2, %v1024_v18  ;;  %v1036_v22 = vsel %vm278_vm2, %v1025_v19, 0 }
  0xc4   : > { %v1125_v23 = vpop.permute.xlu0 %1124  ;;  %v1127_v24 = vpop.permute.xlu1 %1126 }
  0xc5   : > { %v1133_v27 = vsel %vm1132_vm10, %v1125_v23, %v1127_v24 }
  0xc6   : > { %1844 = vmatmul.mubr.msk.bf16.vlgmr.msra.gmra.mrb[24].mxu0 %vm274_vm3, %v1842_v20  ;;  %1972 = vmatmul.mubr.msk.bf16.vlgmr.msra.gmra.mrb[24].mxu1 %vm274_vm3, %v1842_v20  ;;  %v1140_v31 = vsel %vm278_vm2, %v1133_v27, 0 }
  0xc7   : > { %1039 = vmatpush1.bf16.msra.mxu0 %v1030_v21  ;;  %1976 = vmatpush3.bf16.msra.mxu1 %v1036_v22 }
  0xc8   : > { %v1129_v25 = vpop.permute.xlu0 %1128  ;;  %v1131_v26 = vpop.permute.xlu1 %1130  ;;  %1070 = vmatprep.mubr.bf16.mxu0 %v2078_v9  ;;  %1977 = vmatprep.mubr.msk.bf16.mxu1 %vm2079_vm0, %v2076_v6 }
  0xc9   : > { %v1134_v28 = vsel %vm1132_vm10, %v1127_v24, %v1129_v25  ;;  %v1135_v29 = vsel %vm1132_vm10, %v1129_v25, %v1131_v26  ;;  %1981 = vmatprep.subr.bf16.mxu1 %v2076_v6 }
  0xca   : > { %1851 = vmatprep.subr.msk.bf16.mxu0 %vm278_vm2, %v1134_v28  ;;  %v1146_v32 = vsel %vm278_vm2, %v1135_v29, 0 }
  0xce   : > { %1848 = vmatmul.mubr.msk.bf16.vlgmr.msra.gmra.mrb[28].mxu0 %vm274_vm3, %v1846_v30  ;;  %1978 = vmatmul.mubr.msk.bf16.vlgmr.msra.gmra.mrb[28].mxu1 %vm274_vm3, %v1846_v30 }
  0xcf   : > { %1149 = vmatpush1.bf16.msra.mxu0 %v1140_v31  ;;  %1982 = vmatpush3.bf16.msra.mxu1 %v1146_v32 }
  0xd0   : > { %1180 = vmatprep.mubr.bf16.mxu0 %v2078_v9  ;;  %1983 = vmatprep.mubr.msk.bf16.mxu1 %vm2079_vm0, %v2076_v6 }
  0xd6   : > { %1852 = vmatmul.mubr.msk.bf16.vlgmr.msra.gmra.mrb[32].mxu0 %vm274_vm3, %v1850_v33  ;;  %1984 = vmatmul.mubr.msk.bf16.vlgmr.msra.gmra.mrb[32].mxu1 %vm274_vm3, %v1850_v33 }
 0x169   : > { %v322_v34 = vpop.f32.mrb[0].mxu0  ;;  %v363_v35 = vpop.f32.mrb[0].mxu1 }
 0x16a   : > { %v324_v36 = vpop.f32.mrb[1].mxu0  ;;  %v1937_v37 = vpop.f32.mrb[1].mxu1 }
 0x16b   : > { %v326_v38 = vpop.f32.mrb[2].mxu0  ;;  %v366_v9 = vpop.f32.mrb[2].mxu1 }
 0x16c   : > { %v327_v39 = vpop.f32.mrb[3].mxu0  ;;  %v1938_v40 = vpop.f32.mrb[3].mxu1 }
 0x171   : > { %v415_v6 = vpop.f32.mrb[4].mxu0  ;;  %v456_v41 = vpop.f32.mrb[4].mxu1 }
 0x172   : > { %v416_v42 = vadd.f32 %v415_v6, %v322_v34  ;;  %v457_v43 = vadd.f32 %v456_v41, %v363_v35  ;;  %v417_v44 = vpop.f32.mrb[5].mxu0  ;;  %v1943_v45 = vpop.f32.mrb[5].mxu1 }
 0x173   : > { %v418_v46 = vadd.f32 %v417_v44, %v324_v36  ;;  %v419_v47 = vpop.f32.mrb[6].mxu0  ;;  %v459_v48 = vpop.f32.mrb[6].mxu1 }
 0x174   : > { %v420_v49 = vpop.f32.mrb[7].mxu0  ;;  %v1944_v50 = vpop.f32.mrb[7].mxu1 }
 0x179   : > { %v522_v51 = vpop.f32.mrb[8].mxu0  ;;  %v563_v52 = vpop.f32.mrb[8].mxu1 }
 0x17a   : > { %v569_v53 = vadd.f32 %v522_v51, %v416_v42  ;;  %v571_v54 = vadd.f32 %v563_v52, %v457_v43  ;;  %v524_v55 = vpop.f32.mrb[9].mxu0  ;;  %v1949_v56 = vpop.f32.mrb[9].mxu1 }
 0x17b   : > { %v570_v57 = vadd.f32 %v524_v55, %v418_v46  ;;  %v526_v58 = vpop.f32.mrb[10].mxu0  ;;  %v566_v59 = vpop.f32.mrb[10].mxu1 }
 0x17c   : > { %v527_v60 = vpop.f32.mrb[11].mxu0  ;;  %v1950_v61 = vpop.f32.mrb[11].mxu1 }
 0x181   : > { %v632_v62 = vpop.f32.mrb[12].mxu0  ;;  %v673_v63 = vpop.f32.mrb[12].mxu1 }
 0x182   : > { %v679_v0 = vadd.f32 %v632_v62, %v569_v53  ;;  %v681_v1 = vadd.f32 %v673_v63, %v571_v54  ;;  %v634_v2 = vpop.f32.mrb[13].mxu0  ;;  %v1955_v3 = vpop.f32.mrb[13].mxu1 }
 0x183   : > { %v680_v4 = vadd.f32 %v634_v2, %v570_v57  ;;  %v636_v5 = vpop.f32.mrb[14].mxu0  ;;  %v676_v7 = vpop.f32.mrb[14].mxu1 }
 0x184   : > { %v637_v8 = vpop.f32.mrb[15].mxu0  ;;  %v1956_v10 = vpop.f32.mrb[15].mxu1 }
 0x185   : > { %v1236_v53 = vpop.permute.xlu0 %1235 }
 0x189   : > { %v742_v11 = vpop.f32.mrb[16].mxu0  ;;  %v783_v12 = vpop.f32.mrb[16].mxu1 }
 0x18a   : > { %v789_v13 = vadd.f32 %v742_v11, %v679_v0  ;;  %v791_v14 = vadd.f32 %v783_v12, %v681_v1  ;;  %v744_v15 = vpop.f32.mrb[17].mxu0  ;;  %v1961_v16 = vpop.f32.mrb[17].mxu1 }
 0x18b   : > { %v790_v17 = vadd.f32 %v744_v15, %v680_v4  ;;  %v746_v18 = vpop.f32.mrb[18].mxu0  ;;  %v786_v19 = vpop.f32.mrb[18].mxu1 }
 0x18c   : > { %v747_v20 = vpop.f32.mrb[19].mxu0  ;;  %v1962_v21 = vpop.f32.mrb[19].mxu1 }
 0x191   : > { %v852_v22 = vpop.f32.mrb[20].mxu0  ;;  %v893_v23 = vpop.f32.mrb[20].mxu1 }
 0x192   : > { %v899_v24 = vadd.f32 %v852_v22, %v789_v13  ;;  %v901_v25 = vadd.f32 %v893_v23, %v791_v14  ;;  %v854_v26 = vpop.f32.mrb[21].mxu0  ;;  %v1967_v27 = vpop.f32.mrb[21].mxu1 }
 0x193   : > { %v900_v28 = vadd.f32 %v854_v26, %v790_v17  ;;  %v856_v29 = vpop.f32.mrb[22].mxu0  ;;  %v896_v30 = vpop.f32.mrb[22].mxu1 }
 0x194   : > { %v857_v31 = vpop.f32.mrb[23].mxu0  ;;  %v1968_v32 = vpop.f32.mrb[23].mxu1 }
 0x199   : > { %v962_v33 = vpop.f32.mrb[24].mxu0  ;;  %v1003_v34 = vpop.f32.mrb[24].mxu1 }
 0x19a   : > { %v1009_v35 = vadd.f32 %v962_v33, %v899_v24  ;;  %v1011_v36 = vadd.f32 %v1003_v34, %v901_v25  ;;  %v964_v37 = vpop.f32.mrb[25].mxu0  ;;  %v1973_v38 = vpop.f32.mrb[25].mxu1 }
 0x19b   : > { %v1010_v9 = vadd.f32 %v964_v37, %v900_v28  ;;  %v966_v39 = vpop.f32.mrb[26].mxu0  ;;  %v1006_v40 = vpop.f32.mrb[26].mxu1 }
 0x19c   : > { %v967_v6 = vpop.f32.mrb[27].mxu0  ;;  %v1974_v41 = vpop.f32.mrb[27].mxu1 }
 0x1a1   : > { %v1072_v42 = vpop.f32.mrb[28].mxu0  ;;  %v1113_v43 = vpop.f32.mrb[28].mxu1 }
 0x1a2   : > { %v1119_v44 = vadd.f32 %v1072_v42, %v1009_v35  ;;  %v1121_v45 = vadd.f32 %v1113_v43, %v1011_v36  ;;  %v1074_v46 = vpop.f32.mrb[29].mxu0  ;;  %v1979_v47 = vpop.f32.mrb[29].mxu1 }
 0x1a3   : > { %v1120_v48 = vadd.f32 %v1074_v46, %v1010_v9  ;;  %v1076_v49 = vpop.f32.mrb[30].mxu0  ;;  %v1116_v50 = vpop.f32.mrb[30].mxu1 }
 0x1a4   : > { %v1077_v51 = vpop.f32.mrb[31].mxu0  ;;  %v1980_v52 = vpop.f32.mrb[31].mxu1 }
 0x1a9   : > { %v1182_v54 = vpop.f32.mrb[32].mxu0  ;;  %v1223_v55 = vpop.f32.mrb[32].mxu1 }
 0x1aa   : > { %v1229_v56 = vadd.f32 %v1182_v54, %v1119_v44  ;;  %v1231_v57 = vadd.f32 %v1223_v55, %v1121_v45  ;;  %v1184_v58 = vpop.f32.mrb[33].mxu0  ;;  %v1985_v59 = vpop.f32.mrb[33].mxu1 }
 0x1ab   : > { %v1230_v60 = vadd.f32 %v1184_v58, %v1120_v48  ;;  %v1186_v61 = vpop.f32.mrb[34].mxu0  ;;  %v1226_v62 = vpop.f32.mrb[34].mxu1 }
 0x1ac   : > { %v1238_v63 = vadd.f32 %v1236_v53, %v1229_v56  ;;  %v1240_v0 = vadd.f32 %v1236_v53, %v1231_v57  ;;  %v1187_v1 = vpop.f32.mrb[35].mxu0  ;;  %v1986_v2 = vpop.f32.mrb[35].mxu1 }
 0x1ad   : > { %v1239_v3 = vadd.f32 %v1236_v53, %v1230_v60 }
 0x1ae   : > { %v1902_v4 = vpack.c.bf16 %v1240_v0, %v1240_v0 }
 0x1af   : > { %v1901_v5 = vpack.c.bf16 %v1239_v3, %v1238_v63 }
 0x1b0   : > { %1271 = vst [vmem:[%s1269_s14 + $0x8] sm:$0xf] %v1902_v4 }
 0x1b1   : > { %1270 = vst [vmem:[%s1269_s14] sm:$0xff] %v1901_v5 }
 0x1b2 PF: > { %p1860_p10 = scmp.lt.s32.totalorder %s2121_s16, 1 }
 0x1b3   : > { %s2282_s18 = sadd.s32 (!%p1860_p10), 2, %s2121_s16  ;;  %v2087_v7 = vmov (!%p1860_p10), 0.0   ;;  %v2088_v8 = vmov (!%p1860_p10), 0   ;;  %vm2089_vm11 = vmmov (!%p1860_p10), 0   ;;  %p1321_p11 = scmp.ge.s32.totalorder (!%p1860_p10), %s2127_s17, 0  ;;  %vm1373_vm12 = vcmask (!%p1860_p10), 1043456  }
 0x1b4   : > { %1275 = sbr.rel (%p1860_p10) target bundleno = 704 (0x2c0), region = 48  ;;  %s1344_s19 = ssub.s32 (!%p1860_p10), 0, %s2282_s18  ;;  %1987 = vmatprep.subr.bf16.mxu1 (!%p1860_p10), %v2087_v7  ;;  %1415 = vmatprep.mubr.bf16.mxu0 (!%p1860_p10), %v2088_v8  ;;  %v1277_v10 = vld [vmem:[%s2374_s3 + $0x4] sm:$0xf] (!%p1860_p10)  ;;  %vm1369_vm13 = vcmask (!%p1860_p10), 64512  }
 0x1b5   : > { %s1867_s20 = smin.u32 (!%p1860_p10), %s1344_s19, %s2282_s18  ;;  %1989 = vmatprep.mubr.msk.bf16.mxu1 (!%p1860_p10), %vm2089_vm11, %v2087_v7  ;;  %p1322_p12 = scmp.le.s32.totalorder (!%p1860_p10), %s2127_s17, 3  ;;  %v1276_v25 = vld [vmem:[%s2374_s3] sm:$0xf] (!%p1860_p10)  ;;  %v1278_v34 = vld [vmem:[%s2374_s3 + $0x8] sm:$0xf] (!%p1860_p10) }
 0x1b6   : > { %2061 = sdivrem.u32 (!%p1860_p10), %s1867_s20, 3  ;;  %s2293_s21 = sadd.s32 (!%p1860_p10), 1, %s2121_s16 }
 0x1b7   : > { %s1279_s22 = sadd.s32 (!%p1860_p10), 4294967294, %s2121_s16  ;;  %p1343_p13 = scmp.lt.s32.totalorder (!%p1860_p10), %s2282_s18, 0 }
 0x1b8   : > { %p1323_p0 = pnand (!%p1860_p10), %p1322_p12, %p1321_p11  ;;  %s1303_s23 = ssub.s32 (!%p1860_p10), 0, %s2293_s21 }
 0x1b9   : > { %p2298_p1 = scmp.ge.s32.totalorder (!%p1860_p10), %s1279_s22, 0  ;;  %s1862_s26 = smin.u32 (!%p1860_p10), %s1303_s23, %s2293_s21 }
 0x1ba   : > { %p2303_p2 = scmp.le.s32.totalorder (!%p1860_p10), %s1279_s22, 3  ;;  %2063 = sdivrem.u32 (!%p1860_p10), %s1862_s26, 3 }
 0x1bb   : > { %s1866_s25 = scalar_select %p1323_p0, 0, 1 }
 0x1bc   : > { %p1302_p3 = scmp.lt.s32.totalorder %s2293_s21, 0  ;;  %p1282_p4 = pnand %p2303_p2, %p2298_p1 }
 0x1bd   : > { %s1326_s17 = scvt.s32.f32 %s1866_s25  ;;  %s2313_s30 = sadd.s32 3, %s2121_s16 }
 0x1be   : > { %s1588_s12 = ssub.s32 0, %s2313_s30  ;;  %p1565_p9 = scmp.ge.s32.totalorder %s2121_s16, 0 }
 0x1bf   : > { %s1329_s29 = sshrl.u32 %s1326_s17, 16  ;;  %s2062_s5 = spop.drf %2061 }
 0x1c0   : > { %s1330_s6 = sand.u32 1, %s1329_s29  ;;  %s1348_s7 = ssub.s32 0, %s2062_s5 }
 0x1c1   : > { %s1331_s8 = sadd.s32 32767, %s1330_s6  ;;  %s2387_s7 = smov (!%p1343_p13, %s1348_s7), %s2062_s5 }
 0x1c2   : > { %p1328_p5 = scmp.ne.f32.partialorder %s1326_s17, %s1326_s17  ;;  %s1332_s9 = sadd.s32 %s1331_s8, %s1326_s17 }
 0x1c3   : > { %p1869_p6 = scmp.lt.s32.totalorder %s2387_s7, 0  ;;  %s1354_s10 = sadd.s32 3, %s2387_s7 }
 0x1c4   : > { %s1333_s11 = sand.u32 4294901760, %s1332_s9  ;;  %s2064_s14 = spop.drf %2063 }
 0x1c5   : > { %s2389_s10 = smov (!%p1869_p6, %s1354_s10), %s2387_s7  ;;  %s2391_s11 = smov (%p1328_p5, %s1333_s11), 2143289344 }
 0x1c6   : > { %s1905_s13 = smul.u32 12, %s2389_s10  ;;  %s1336_s19 = sshrl.u32 %s2391_s11, 16 }
 0x1c7   : > { %s1307_s20 = ssub.s32 0, %s2064_s14  ;;  %s1337_s23 = sshll.u32 %s1336_s19, 16 }
 0x1c8   : > { %s1358_s25 = scalar_lea.vmem [#allocation2], %s1905_s13  ;;  %s1338_s26 = sor.u32 %s1337_s23, %s1336_s19 }
 0x1c9   : > { %v1359_v11 = vld [vmem:[%s1358_s25] sm:$0xff]  ;;  %v2054_v12 = vld [vmem:[%s1358_s25 + $0x8] ss:$0 sps:$4 sm:$0xff]   ;;  %s1884_s17 = smin.u32 %s1588_s12, %s2313_s30  ;;  %v1339_v15 = vstv %s1338_s26  ;;  %s2393_s20 = smov (!%p1302_p3, %s1307_s20), %s2064_s14 }
 0x1ca   : > { %v1872_v13 = vcombine.high %v1359_v11, %v1359_v11  ;;  %v1871_v14 = vcombine.low %v1359_v11, %v1359_v11  ;;  %v1381_v16 = vsel %vm1373_vm12, %v2054_v12, 0  ;;  %v1341_v17 = vmul.bf16 %v1339_v15, %v1277_v10  ;;  %s1861_s29 = scalar_select %p1282_p4, 0, 1 }
 0x1cb   : > { %1988 = vmatpush3.bf16.msra.mxu1 %v1381_v16  ;;  %p1864_p7 = scmp.lt.s32.totalorder %s2393_s20, 0  ;;  %s1313_s5 = sadd.s32 3, %s2393_s20 }
 0x1cc   : > { %1874 = vmatprep.subr.msk.bf16.mxu0 %vm1373_vm12, %v1872_v13  ;;  %v1375_v18 = vsel %vm1373_vm12, %v1871_v14, 0  ;;  %1993 = vmatprep.subr.bf16.mxu1 %v2087_v7  ;;  %s1285_s21 = scvt.s32.f32 %s1861_s29  ;;  %2065 = sdivrem.u32 %s1884_s17, 3 }
 0x1cd   : > { %1384 = vmatpush1.bf16.msra.mxu0 %v1375_v18  ;;  %s2395_s5 = smov (!%p1864_p7, %s1313_s5), %s2393_s20  ;;  %p1587_p10 = scmp.lt.s32.totalorder %s2313_s30, 0 }
 0x1ce   : > { %1990 = vmatmul.mubr.msk.bf16.vlgmr.msra.gmra.mrb[0].mxu1 %vm1369_vm13, %v1341_v17  ;;  %p1287_p8 = scmp.ne.f32.partialorder %s1285_s21, %s1285_s21  ;;  %s1288_s24 = sshrl.u32 %s1285_s21, 16 }
 0x1cf   : > { %s1904_s28 = smul.u32 12, %s2395_s5  ;;  %1995 = vmatprep.mubr.msk.bf16.mxu1 %vm2089_vm11, %v2087_v7  ;;  %s1289_s6 = sand.u32 1, %s1288_s24 }
 0x1d0   : > { %1875 = vmatmul.mubr.msk.bf16.vlgmr.msra.gmra.mrb[0].mxu0 %vm1369_vm13, %v1341_v17  ;;  %s1290_s7 = sadd.s32 32767, %s1289_s6  ;;  %p1566_p11 = scmp.le.s32.totalorder %s2121_s16, 3 }
 0x1d1   : > { %1516 = vmatprep.mubr.bf16.mxu0 %v2088_v8  ;;  %s1291_s8 = sadd.s32 %s1290_s7, %s1285_s21  ;;  %s1317_s9 = scalar_lea.vmem [#allocation2], %s1904_s28 }
 0x1d2   : > { %v1318_v19 = vld [vmem:[%s1317_s9] sm:$0xff]  ;;  %v2057_v20 = vld [vmem:[%s1317_s9 + $0x8] ss:$0 sps:$4 sm:$0xff]   ;;  %s1292_s10 = sand.u32 4294901760, %s1291_s8  ;;  %p1567_p12 = pnand %p1566_p11, %p1565_p9 }
 0x1d3   : > { %v1878_v21 = vcombine.high %v1318_v19, %v1318_v19  ;;  %v1877_v22 = vcombine.low %v1318_v19, %v1318_v19  ;;  %s2397_s10 = smov (%p1287_p8, %s1292_s10), 2143289344  ;;  %v1482_v23 = vsel %vm1373_vm12, %v2057_v20, 0 }
 0x1d4   : > { %1994 = vmatpush3.bf16.msra.mxu1 %v1482_v23  ;;  %s1295_s11 = sshrl.u32 %s2397_s10, 16 }
 0x1d5   : > { %1880 = vmatprep.subr.msk.bf16.mxu0 %vm1373_vm12, %v1878_v21  ;;  %v1476_v24 = vsel %vm1373_vm12, %v1877_v22, 0  ;;  %s2066_s12 = spop.drf %2065  ;;  %s1296_s19 = sshll.u32 %s1295_s11, 16  ;;  %1999 = vmatprep.subr.bf16.mxu1 %v2087_v7 }
 0x1d6   : > { %1485 = vmatpush1.bf16.msra.mxu0 %v1476_v24  ;;  %s1592_s20 = ssub.s32 0, %s2066_s12  ;;  %s1297_s22 = sor.u32 %s1296_s19, %s1295_s11 }
 0x1d7   : > { %v1298_v26 = vstv %s1297_s22  ;;  %s2399_s20 = smov (!%p1587_p10, %s1592_s20), %s2066_s12 }
 0x1d8   : > { %v1300_v27 = vmul.bf16 %v1298_v26, %v1276_v25  ;;  %s1883_s18 = scalar_select %p1567_p12, 0, 1 }
 0x1d9   : > { %p1886_p13 = scmp.lt.s32.totalorder %s2399_s20, 0  ;;  %s1598_s23 = sadd.s32 3, %s2399_s20 }
 0x1da   : > { %1996 = vmatmul.mubr.msk.bf16.vlgmr.msra.gmra.mrb[0].mxu1 %vm1369_vm13, %v1300_v27  ;;  %s1570_s25 = scvt.s32.f32 %s1883_s18 }
 0x1db   : > { %s2401_s23 = smov (!%p1886_p13, %s1598_s23), %s2399_s20  ;;  %2001 = vmatprep.mubr.msk.bf16.mxu1 %vm2089_vm11, %v2087_v7 }
 0x1dc   : > { %1881 = vmatmul.mubr.msk.bf16.vlgmr.msra.gmra.mrb[0].mxu0 %vm1369_vm13, %v1300_v27  ;;  %p1572_p0 = scmp.ne.f32.partialorder %s1570_s25, %s1570_s25  ;;  %s1573_s16 = sshrl.u32 %s1570_s25, 16 }
 0x1dd   : > { %1657 = vmatprep.mubr.bf16.mxu0 %v2088_v8  ;;  %s1906_s26 = smul.u32 12, %s2401_s23  ;;  %s1574_s30 = sand.u32 1, %s1573_s16 }
 0x1de   : > { %s1575_s17 = sadd.s32 32767, %s1574_s30 }
 0x1df   : > { %s1576_s29 = sadd.s32 %s1575_s17, %s1570_s25  ;;  %s1602_s5 = scalar_lea.vmem [#allocation2], %s1906_s26 }
 0x1e0   : > { %v1603_v28 = vld [vmem:[%s1602_s5] sm:$0xff]  ;;  %v2060_v29 = vld [vmem:[%s1602_s5 + $0x8] ss:$0 sps:$4 sm:$0xff]   ;;  %s1577_s21 = sand.u32 4294901760, %s1576_s29 }
 0x1e1   : > { %v1889_v30 = vcombine.high %v1603_v28, %v1603_v28  ;;  %v1888_v31 = vcombine.low %v1603_v28, %v1603_v28  ;;  %s2403_s21 = smov (%p1572_p0, %s1577_s21), 2143289344  ;;  %v1623_v32 = vsel %vm1373_vm12, %v2060_v29, 0 }
 0x1e2   : > { %2000 = vmatpush3.bf16.msra.mxu1 %v1623_v32  ;;  %s1580_s24 = sshrl.u32 %s2403_s21, 16 }
 0x1e3   : > { %1891 = vmatprep.subr.msk.bf16.mxu0 %vm1373_vm12, %v1889_v30  ;;  %v1617_v33 = vsel %vm1373_vm12, %v1888_v31, 0  ;;  %s1581_s7 = sshll.u32 %s1580_s24, 16 }
 0x1e4   : > { %1626 = vmatpush1.bf16.msra.mxu0 %v1617_v33  ;;  %s1582_s8 = sor.u32 %s1581_s7, %s1580_s24 }
 0x1e5   : > { %v1583_v35 = vstv %s1582_s8 }
 0x1e6   : > { %v1585_v36 = vmul.bf16 %v1583_v35, %v1278_v34 }
 0x1e8   : > { %1892 = vmatmul.mubr.msk.bf16.vlgmr.msra.gmra.mrb[0].mxu0 %vm1369_vm13, %v1585_v36  ;;  %2002 = vmatmul.mubr.msk.bf16.vlgmr.msra.gmra.mrb[0].mxu1 %vm1369_vm13, %v1585_v36 }
 0x2bb   : > { %v1659_v37 = vpop.f32.mrb[0].mxu0  ;;  %v1700_v38 = vpop.f32.mrb[0].mxu1 }
 0x2bc   : > { %v1908_v9 = vpack.c.bf16 %v1700_v38, %v1700_v38  ;;  %v1661_v39 = vpop.f32.mrb[1].mxu0  ;;  %v2003_v40 = vpop.f32.mrb[1].mxu1 }
 0x2bd   : > { %v1907_v6 = vpack.c.bf16 %v1661_v39, %v1659_v37  ;;  %v1663_v41 = vpop.f32.mrb[2].mxu0  ;;  %v1703_v42 = vpop.f32.mrb[2].mxu1 }
 0x2be   : > { %1723 = vst [vmem:[%s2139_s27 + $0x8] sm:$0xf] %v1908_v9  ;;  %v1664_v43 = vpop.f32.mrb[3].mxu0  ;;  %v2004_v44 = vpop.f32.mrb[3].mxu1 }
 0x2bf   : > { %1722 = vst [vmem:[%s2139_s27] sm:$0xff] %v1907_v6 }
 0x2c0 PF: > { %s14_s15 = sadd.s32 1, %s2073_s15  }
 0x2c1   : > { %p11_p1 = scmp.ge.s32.totalorder %s14_s15, 7  }
 0x2c3   :  { %13 = sbr.rel (!%p11_p1) target bundleno = 1 (0x1), region = 90 }

</bundles_post_ra>
